<compile_context>
chip_gen: v7x
topology: tpu7x:2x2x1
jax: 0.10.0
libtpu: 0.0.40
codegen_flags: <defaults>
</compile_context>

<pallas_src>
import functools

import jax
import jax.numpy as jnp
from jax.experimental import pallas as pl
from jax.experimental.pallas import tpu as pltpu

_SQRT2 = 1.4142135623730951


def _gelu_exact(x):
    # nn.GELU() default = exact erf-based GELU
    return 0.5 * x * (1.0 + jax.lax.erf(x / _SQRT2))


def _round_up(x, m):
    return (x + m - 1) // m * m


def ts_mlp_kernel(xp_ref, wpe_ref, bpe_ref, w1_ref, b1_ref, w2_ref, b2_ref, out_ref):
    # xp_ref : (TM, Kp)  row tile of flattened patches (K zero-padded to Kp)
    # wpe_ref: (Kp, Ep)  patch-embedding (= Conv1d) weight, bpe_ref: (1, Ep) bias
    # w1/b1  : shared hidden Linear, w2/b2: final Linear (all E-padded to Ep)
    # Matmul operands take the weights' dtype (f32 or bf16) with f32 accumulation;
    # bias add + GELU stay in f32.
    cdt = w1_ref.dtype

    emb = jnp.dot(xp_ref[...].astype(cdt), wpe_ref[...],
                  preferred_element_type=jnp.float32) + bpe_ref[...]

    # main_net = [L1, GELU, Drop, L1, GELU, Drop, L2]  (L1 weights shared)
    h = _gelu_exact(jnp.dot(emb.astype(cdt), w1_ref[...],
                            preferred_element_type=jnp.float32) + b1_ref[...])
    h = _gelu_exact(jnp.dot(h.astype(cdt), w1_ref[...],
                            preferred_element_type=jnp.float32) + b1_ref[...])
    out = jnp.dot(h.astype(cdt), w2_ref[...],
                  preferred_element_type=jnp.float32) + b2_ref[...]

    out_ref[...] = out.astype(out_ref.dtype)


@functools.partial(jax.jit, static_argnames=("patch_size", "use_bf16"))
def ts_mlp_forward(x, params, patch_size, use_bf16=False):
    B, S, C = x.shape
    P = S // patch_size
    K = patch_size * C
    wpe = params["wpe"]          # (K, E)
    bpe = params["bpe"]          # (1, E)
    cls_tok = params["cls"]      # (1, E)
    w1, b1 = params["w1"], params["b1"]   # (E, E), (1, E)
    w2, b2 = params["w2"], params["b2"]   # (E, E), (1, E)
    E = wpe.shape[1]

    # ---- cls-token row: batch-invariant -> compute once, outside the kernel ----
    cls_h = _gelu_exact(cls_tok @ w1 + b1)
    cls_h = _gelu_exact(cls_h @ w1 + b1)
    cls_out = (cls_h @ w2 + b2).astype(x.dtype)                     # (1, E)

    # ---- fold batch into the M dimension; pad K/E to lane width, rows to 8 ----
    N = B * P
    Kp = _round_up(K, 128)
    Ep = _round_up(E, 128)
    TM = 256 if N >= 256 else _round_up(max(N, 8), 8)
    N_pad = _round_up(N, TM)

    # x[b, p*ps + k, c] flattened over (k, c) -> (B*P, ps*C), zero-padded.
    xp = x[:, :P * patch_size, :].reshape(N, K)
    xp = jnp.pad(xp, ((0, N_pad - N), (0, Kp - K)))

    wdt = jnp.bfloat16 if use_bf16 else wpe.dtype
    wpe_p = jnp.pad(wpe, ((0, Kp - K), (0, Ep - E))).astype(wdt)
    w1_p = jnp.pad(w1, ((0, Ep - E), (0, Ep - E))).astype(wdt)
    w2_p = jnp.pad(w2, ((0, Ep - E), (0, Ep - E))).astype(wdt)
    bpe_p = jnp.pad(bpe, ((0, 0), (0, Ep - E))).astype(jnp.float32)
    b1_p = jnp.pad(b1, ((0, 0), (0, Ep - E))).astype(jnp.float32)
    b2_p = jnp.pad(b2, ((0, 0), (0, Ep - E))).astype(jnp.float32)

    # Explicit VMEM budget (v7x only has 64 MiB physical / 32 MiB scoped default):
    # double-buffered activation tiles + resident (double-buffered) weights +
    # headroom for the kernel's f32 intermediates.
    w_itemsize = 2 if use_bf16 else 4
    act_bytes = 2 * TM * (Kp + Ep) * x.dtype.itemsize
    wt_bytes = 2 * ((Kp * Ep + 2 * Ep * Ep) * w_itemsize + 3 * Ep * 4)
    scratch_bytes = 4 * TM * Ep * 4
    vmem_budget = min(act_bytes + wt_bytes + scratch_bytes + (4 << 20), 48 << 20)

    # TODO(synk): for very large E, give the weight BlockSpecs
    # pipeline_mode=pl.Buffered(1) to reclaim the redundant second weight buffer.
    out_pad = pl.pallas_call(
        ts_mlp_kernel,
        out_shape=jax.ShapeDtypeStruct((N_pad, Ep), x.dtype),
        grid_spec=pltpu.PrefetchScalarGridSpec(
            num_scalar_prefetch=0,
            grid=(N_pad // TM,),
            in_specs=[
                pl.BlockSpec((TM, Kp), lambda i: (i, 0)),   # patch row tile
                pl.BlockSpec((Kp, Ep), lambda i: (0, 0)),   # patch-embed weight
                pl.BlockSpec((1, Ep), lambda i: (0, 0)),    # patch-embed bias
                pl.BlockSpec((Ep, Ep), lambda i: (0, 0)),   # shared hidden Linear W
                pl.BlockSpec((1, Ep), lambda i: (0, 0)),    # shared hidden Linear b
                pl.BlockSpec((Ep, Ep), lambda i: (0, 0)),   # final Linear W
                pl.BlockSpec((1, Ep), lambda i: (0, 0)),    # final Linear b
            ],
            out_specs=pl.BlockSpec((TM, Ep), lambda i: (i, 0)),
        ),
        compiler_params=pltpu.CompilerParams(
            dimension_semantics=("parallel",),
            vmem_limit_bytes=int(vmem_budget)),
    )(xp, wpe_p, bpe_p, w1_p, b1_p, w2_p, b2_p)

    patch_out = out_pad[:N, :E].reshape(B, P, E)
    cls_rows = jnp.broadcast_to(cls_out[None], (B, 1, E))
    return jnp.concatenate([cls_rows, patch_out], axis=1)     # (B, P+1, E)


def make_params(key, in_chans, patch_size, embed_dim):
    """Deterministic synthetic init (matches shapes of the torch module)."""
    k = jax.random.split(key, 6)
    # Conv1d weight: (embed_dim, in_chans, patch_size)
    w_conv = 0.05 * jax.random.normal(k[0], (embed_dim, in_chans, patch_size), jnp.float32)
    b_conv = 0.05 * jax.random.normal(k[1], (embed_dim,), jnp.float32)
    w1 = 0.05 * jax.random.normal(k[2], (embed_dim, embed_dim), jnp.float32)
    b1 = 0.05 * jax.random.normal(k[3], (embed_dim,), jnp.float32)
    w2 = 0.05 * jax.random.normal(k[4], (embed_dim, embed_dim), jnp.float32)
    b2 = 0.05 * jax.random.normal(k[5], (embed_dim,), jnp.float32)
    cls = jnp.zeros((1, embed_dim), jnp.float32)   # torch: zeros-initialized parameter

    # Flatten the conv weight to a (patch_size*in_chans, embed_dim) matmul weight,
    # matching the (k, c) flattening order of the patch reshape.
    wpe = jnp.transpose(w_conv, (2, 1, 0)).reshape(patch_size * in_chans, embed_dim)
    return {
        "wpe": wpe, "bpe": b_conv.reshape(1, embed_dim), "cls": cls,
        "w1": w1, "b1": b1.reshape(1, embed_dim),
        "w2": w2, "b2": b2.reshape(1, embed_dim),
    }, (w_conv, b_conv)


def reference_forward(x, w_conv, b_conv, cls, w1, b1, w2, b2, patch_size):
    """Plain-JAX reference mirroring the torch forward (eval mode)."""
    B, S, C = x.shape
    P = S // patch_size
    E = w_conv.shape[0]
    x_ncl = jnp.transpose(x, (0, 2, 1))[:, :, :P * patch_size]          # (B, C, S)
    xw = x_ncl.reshape(B, C, P, patch_size)
    emb = jnp.einsum("bcpk,eck->bpe", xw, w_conv) + b_conv               # Conv1d
    cls_t = jnp.broadcast_to(cls.reshape(1, 1, E), (B, 1, E))
    t = jnp.concatenate([cls_t, emb], axis=1)
    h = _gelu_exact(t @ w1 + b1)
    h = _gelu_exact(h @ w1 + b1)
    return h @ w2 + b2


if __name__ == "__main__":
    # --- small primary check (f32, single tile) ---
    B, S, C = 2, 32, 4
    patch_size, embed_dim = 16, 32

    key = jax.random.PRNGKey(0)
    kx, kp = jax.random.split(key)
    x = jax.random.normal(kx, (B, S, C), jnp.float32)
    params, (w_conv, b_conv) = make_params(kp, C, patch_size, embed_dim)

    out = jax.block_until_ready(ts_mlp_forward(x, params, patch_size))
    ref = jax.block_until_ready(reference_forward(
        x, w_conv, b_conv, params["cls"], params["w1"], params["b1"][0],
        params["w2"], params["b2"][0], patch_size))
    assert out.shape == (B, S // patch_size + 1, embed_dim), out.shape
    assert jnp.max(jnp.abs(out - ref)) < 1e-4, float(jnp.max(jnp.abs(out - ref)))

    # --- secondary check: multi-tile grid + row padding + bf16 MXU operands ---
    B2, S2, C2 = 5, 1024, 3
    ps2, E2 = 16, 80
    kx2, kp2 = jax.random.split(jax.random.PRNGKey(1))
    x2 = jax.random.normal(kx2, (B2, S2, C2), jnp.float32)
    params2, (w_conv2, b_conv2) = make_params(kp2, C2, ps2, E2)

    out2 = jax.block_until_ready(ts_mlp_forward(x2, params2, ps2, use_bf16=True))
    ref2 = jax.block_until_ready(reference_forward(
        x2, w_conv2, b_conv2, params2["cls"], params2["w1"], params2["b1"][0],
        params2["w2"], params2["b2"][0], ps2))
    assert out2.shape == (B2, S2 // ps2 + 1, E2), out2.shape
    assert jnp.max(jnp.abs(out2 - ref2)) < 5e-2, float(jnp.max(jnp.abs(out2 - ref2)))

    print("KERNEL_OK")
</pallas_src>

<mosaic_0001>
module attributes {stable_mosaic.version = 11 : i64} {
  func.func @ts_mlp_kernel(%arg0: i32, %arg1: memref<8x128xf32, #tpu.memory_space<vmem>>, %arg2: memref<128x128xf32, #tpu.memory_space<vmem>>, %arg3: memref<1x128xf32, #tpu.memory_space<vmem>>, %arg4: memref<128x128xf32, #tpu.memory_space<vmem>>, %arg5: memref<1x128xf32, #tpu.memory_space<vmem>>, %arg6: memref<128x128xf32, #tpu.memory_space<vmem>>, %arg7: memref<1x128xf32, #tpu.memory_space<vmem>>, %arg8: memref<8x128xf32, #tpu.memory_space<vmem>>) attributes {dimension_semantics = [#tpu.dimension_semantics<parallel>], iteration_bounds = array<i64: 1>, scalar_prefetch = 0 : i64, scratch_operands = 0 : i64, tpu.core_type = #tpu.core_type<tc>, window_params = [{transform_indices = @transform_0, window_bounds = array<i64: 8, 128>}, {pipeline_mode = #tpu.pipeline_mode<synchronous>, transform_indices = @transform_1, window_bounds = array<i64: 128, 128>}, {pipeline_mode = #tpu.pipeline_mode<synchronous>, transform_indices = @transform_2, window_bounds = array<i64: 1, 128>}, {pipeline_mode = #tpu.pipeline_mode<synchronous>, transform_indices = @transform_3, window_bounds = array<i64: 128, 128>}, {pipeline_mode = #tpu.pipeline_mode<synchronous>, transform_indices = @transform_4, window_bounds = array<i64: 1, 128>}, {pipeline_mode = #tpu.pipeline_mode<synchronous>, transform_indices = @transform_5, window_bounds = array<i64: 128, 128>}, {pipeline_mode = #tpu.pipeline_mode<synchronous>, transform_indices = @transform_6, window_bounds = array<i64: 1, 128>}, {transform_indices = @transform_7, window_bounds = array<i64: 8, 128>}]} {
    %c0 = arith.constant 0 : index
    %c0_0 = arith.constant 0 : index
    %0 = vector.load %arg1[%c0, %c0_0] : memref<8x128xf32, #tpu.memory_space<vmem>>, vector<8x128xf32>
    %c0_1 = arith.constant 0 : index
    %c0_2 = arith.constant 0 : index
    %1 = vector.load %arg2[%c0_1, %c0_2] : memref<128x128xf32, #tpu.memory_space<vmem>>, vector<128x128xf32>
    %cst = arith.constant dense<0.000000e+00> : vector<8x128xf32>
    %2 = tpu.matmul %0, %1, %cst {dimension_numbers = #tpu.dot_dimension_numbers<[1], [0], [0], [1], [0, 0, 1, 1], [], []>} : vector<8x128xf32>, vector<128x128xf32>, vector<8x128xf32> -> vector<8x128xf32>
    %c0_3 = arith.constant 0 : index
    %c0_4 = arith.constant 0 : index
    %3 = vector.load %arg3[%c0_3, %c0_4] : memref<1x128xf32, #tpu.memory_space<vmem>>, vector<1x128xf32>
    %4 = vector.broadcast %3 : vector<1x128xf32> to vector<8x128xf32>
    %5 = arith.addf %2, %4 : vector<8x128xf32>
    %c0_5 = arith.constant 0 : index
    %c0_6 = arith.constant 0 : index
    %6 = vector.load %arg4[%c0_5, %c0_6] : memref<128x128xf32, #tpu.memory_space<vmem>>, vector<128x128xf32>
    %cst_7 = arith.constant dense<0.000000e+00> : vector<8x128xf32>
    %7 = tpu.matmul %5, %6, %cst_7 {dimension_numbers = #tpu.dot_dimension_numbers<[1], [0], [0], [1], [0, 0, 1, 1], [], []>} : vector<8x128xf32>, vector<128x128xf32>, vector<8x128xf32> -> vector<8x128xf32>
    %c0_8 = arith.constant 0 : index
    %c0_9 = arith.constant 0 : index
    %8 = vector.load %arg5[%c0_8, %c0_9] : memref<1x128xf32, #tpu.memory_space<vmem>>, vector<1x128xf32>
    %9 = vector.broadcast %8 : vector<1x128xf32> to vector<8x128xf32>
    %10 = arith.addf %7, %9 : vector<8x128xf32>
    %cst_10 = arith.constant 5.000000e-01 : f32
    %11 = vector.broadcast %cst_10 : f32 to vector<8x128xf32>
    %12 = arith.mulf %11, %10 : vector<8x128xf32>
    %cst_11 = arith.constant 1.41421354 : f32
    %13 = vector.broadcast %cst_11 : f32 to vector<8x128xf32>
    %14 = arith.divf %10, %13 : vector<8x128xf32>
    %15 = math.erf %14 : vector<8x128xf32>
    %cst_12 = arith.constant 1.000000e+00 : f32
    %16 = vector.broadcast %cst_12 : f32 to vector<8x128xf32>
    %17 = arith.addf %16, %15 : vector<8x128xf32>
    %18 = arith.mulf %12, %17 : vector<8x128xf32>
    %c0_13 = arith.constant 0 : index
    %c0_14 = arith.constant 0 : index
    %19 = vector.load %arg4[%c0_13, %c0_14] : memref<128x128xf32, #tpu.memory_space<vmem>>, vector<128x128xf32>
    %cst_15 = arith.constant dense<0.000000e+00> : vector<8x128xf32>
    %20 = tpu.matmul %18, %19, %cst_15 {dimension_numbers = #tpu.dot_dimension_numbers<[1], [0], [0], [1], [0, 0, 1, 1], [], []>} : vector<8x128xf32>, vector<128x128xf32>, vector<8x128xf32> -> vector<8x128xf32>
    %c0_16 = arith.constant 0 : index
    %c0_17 = arith.constant 0 : index
    %21 = vector.load %arg5[%c0_16, %c0_17] : memref<1x128xf32, #tpu.memory_space<vmem>>, vector<1x128xf32>
    %22 = vector.broadcast %21 : vector<1x128xf32> to vector<8x128xf32>
    %23 = arith.addf %20, %22 : vector<8x128xf32>
    %cst_18 = arith.constant 5.000000e-01 : f32
    %24 = vector.broadcast %cst_18 : f32 to vector<8x128xf32>
    %25 = arith.mulf %24, %23 : vector<8x128xf32>
    %cst_19 = arith.constant 1.41421354 : f32
    %26 = vector.broadcast %cst_19 : f32 to vector<8x128xf32>
    %27 = arith.divf %23, %26 : vector<8x128xf32>
    %28 = math.erf %27 : vector<8x128xf32>
    %cst_20 = arith.constant 1.000000e+00 : f32
    %29 = vector.broadcast %cst_20 : f32 to vector<8x128xf32>
    %30 = arith.addf %29, %28 : vector<8x128xf32>
    %31 = arith.mulf %25, %30 : vector<8x128xf32>
    %c0_21 = arith.constant 0 : index
    %c0_22 = arith.constant 0 : index
    %32 = vector.load %arg6[%c0_21, %c0_22] : memref<128x128xf32, #tpu.memory_space<vmem>>, vector<128x128xf32>
    %cst_23 = arith.constant dense<0.000000e+00> : vector<8x128xf32>
    %33 = tpu.matmul %31, %32, %cst_23 {dimension_numbers = #tpu.dot_dimension_numbers<[1], [0], [0], [1], [0, 0, 1, 1], [], []>} : vector<8x128xf32>, vector<128x128xf32>, vector<8x128xf32> -> vector<8x128xf32>
    %c0_24 = arith.constant 0 : index
    %c0_25 = arith.constant 0 : index
    %34 = vector.load %arg7[%c0_24, %c0_25] : memref<1x128xf32, #tpu.memory_space<vmem>>, vector<1x128xf32>
    %35 = vector.broadcast %34 : vector<1x128xf32> to vector<8x128xf32>
    %36 = arith.addf %33, %35 : vector<8x128xf32>
    %c0_26 = arith.constant 0 : index
    %c0_27 = arith.constant 0 : index
    %37 = vector.load %arg8[%c0_26, %c0_27] : memref<8x128xf32, #tpu.memory_space<vmem>>, vector<8x128xf32>
    tpu.vector_store %arg8[%c0_26, %c0_27], %36 {strides = array<i32>} : memref<8x128xf32, #tpu.memory_space<vmem>>, vector<8x128xf32>,
    return
  }
  func.func @transform_0(%arg0: i32) -> (i32, i32) {
    %c0_i32 = arith.constant 0 : i32
    %c0_i32_0 = arith.constant 0 : i32
    return %arg0, %c0_i32 : i32, i32
  }
  func.func @transform_1(%arg0: i32) -> (i32, i32) {
    %c0_i32 = arith.constant 0 : i32
    %c0_i32_0 = arith.constant 0 : i32
    %c0_i32_1 = arith.constant 0 : i32
    return %c0_i32, %c0_i32_0 : i32, i32
  }
  func.func @transform_2(%arg0: i32) -> (i32, i32) {
    %c0_i32 = arith.constant 0 : i32
    %c0_i32_0 = arith.constant 0 : i32
    %c0_i32_1 = arith.constant 0 : i32
    return %c0_i32, %c0_i32_0 : i32, i32
  }
  func.func @transform_3(%arg0: i32) -> (i32, i32) {
    %c0_i32 = arith.constant 0 : i32
    %c0_i32_0 = arith.constant 0 : i32
    %c0_i32_1 = arith.constant 0 : i32
    return %c0_i32, %c0_i32_0 : i32, i32
  }
  func.func @transform_4(%arg0: i32) -> (i32, i32) {
    %c0_i32 = arith.constant 0 : i32
    %c0_i32_0 = arith.constant 0 : i32
    %c0_i32_1 = arith.constant 0 : i32
    return %c0_i32, %c0_i32_0 : i32, i32
  }
  func.func @transform_5(%arg0: i32) -> (i32, i32) {
    %c0_i32 = arith.constant 0 : i32
    %c0_i32_0 = arith.constant 0 : i32
    %c0_i32_1 = arith.constant 0 : i32
    return %c0_i32, %c0_i32_0 : i32, i32
  }
  func.func @transform_6(%arg0: i32) -> (i32, i32) {
    %c0_i32 = arith.constant 0 : i32
    %c0_i32_0 = arith.constant 0 : i32
    %c0_i32_1 = arith.constant 0 : i32
    return %c0_i32, %c0_i32_0 : i32, i32
  }
  func.func @transform_7(%arg0: i32) -> (i32, i32) {
    %c0_i32 = arith.constant 0 : i32
    %c0_i32_0 = arith.constant 0 : i32
    return %arg0, %c0_i32 : i32, i32
  }
}

</mosaic_0001>

<bundles_post_ra>
// kernel: ts_mlp_forward.1
= control target key start
LH: loop header
LB: loop body
LE: loop exit
PB: predicated region body
PF: predicated region fallthrough
CT: control target
= control target key end

     0   :  { %v706_v0 = vmov 0.0|0.0   ;;  %vm707_vm0 = vmmov 0   ;;  %v708_v4 = vmov 0.0   ;;  %s948_s1 = inlined_call_operand.vmem [shape: f32[128,128], index: 1, kind: input, shape index: {}]   ;;  %s949_s3 = inlined_call_operand.vmem [shape: f32[128,128], index: 3, kind: input, shape index: {}]   ;;  %s950_s0 = inlined_call_operand.vmem [shape: f32[8,128], index: 0, kind: input, shape index: {}]   ;;  %s951_s2 = inlined_call_operand.vmem [shape: f32[1,128], index: 2, kind: input, shape index: {}]   ;;  %s952_s5 = inlined_call_operand.vmem [shape: f32[128,128], index: 5, kind: input, shape index: {}]   ;;  %s953_s4 = inlined_call_operand.vmem [shape: f32[1,128], index: 4, kind: input, shape index: {}]   ;;  %s954_s6 = inlined_call_operand.vmem [shape: f32[1,128], index: 6, kind: input, shape index: {}]   ;;  %s955_s7 = inlined_call_operand.vmem [shape: f32[8,128], index: 7, kind: output, shape index: {}]  }
   0x1   :  { %603 = vmatprep.subr.bf16.mxu0 %v706_v0  ;;  %v27_v1 = vld [vmem:[%s948_s1] sm:$0xff]  ;;  %v28_v2 = vld [vmem:[%s948_s1 + $0x8] sm:$0xff]  ;;  %v29_v3 = vld [vmem:[%s948_s1 + $0x10] sm:$0xff]  ;;  %495 = vmatprep.mubr.msk.f32.mxu0 %vm707_vm0, %v708_v4 }
   0x2   :  { %v604_v5 = vpack.c.bf16 %v28_v2, %v27_v1  ;;  %v30_v6 = vld [vmem:[%s948_s1 + $0x18] sm:$0xff]  ;;  %627 = vmatprep.subr.bf16.mxu1 %v706_v0  ;;  %530 = vmatprep.mubr.msk.f32.mxu1 %vm707_vm0, %v708_v4  ;;  %v31_v8 = vld [vmem:[%s948_s1 + $0x20] sm:$0xff]  ;;  %v32_v9 = vld [vmem:[%s948_s1 + $0x28] sm:$0xff] }
   0x3   :  { %v607_v7 = vpack.c.bf16 %v30_v6, %v29_v3  ;;  %v120_v10 = vld [vmem:[%s949_s3] sm:$0xff]  ;;  %v121_v11 = vld [vmem:[%s949_s3 + $0x8] sm:$0xff]  ;;  %v122_v12 = vld [vmem:[%s949_s3 + $0x10] sm:$0xff]  ;;  %v610_v14 = vpack.c.bf16 %v32_v9, %v31_v8 }
   0x4   :  { %605 = vmatpush3.bf16.msra.mxu0 %v604_v5  ;;  %v123_v13 = vld [vmem:[%s949_s3 + $0x18] sm:$0xff]  ;;  %v628_v15 = vpack.c.bf16 %v121_v11, %v120_v10  ;;  %v33_v16 = vld [vmem:[%s948_s1 + $0x30] sm:$0xff]  ;;  %v124_v19 = vld [vmem:[%s949_s3 + $0x20] sm:$0xff] }
   0x5   :  { %606 = vmatprep.subr.bf16.mxu0 %v706_v0  ;;  %v34_v17 = vld [vmem:[%s948_s1 + $0x38] sm:$0xff]  ;;  %v631_v18 = vpack.c.bf16 %v123_v13, %v122_v12  ;;  %v125_v20 = vld [vmem:[%s949_s3 + $0x28] sm:$0xff]  ;;  %v35_v22 = vld [vmem:[%s948_s1 + $0x40] sm:$0xff] }
   0x6   :  { %629 = vmatpush3.bf16.msra.mxu1 %v628_v15  ;;  %v613_v21 = vpack.c.bf16 %v34_v17, %v33_v16  ;;  %v36_v23 = vld [vmem:[%s948_s1 + $0x48] sm:$0xff]  ;;  %v634_v24 = vpack.c.bf16 %v125_v20, %v124_v19  ;;  %v126_v25 = vld [vmem:[%s949_s3 + $0x30] sm:$0xff]  ;;  %v127_v26 = vld [vmem:[%s949_s3 + $0x38] sm:$0xff] }
   0x7   :  { %630 = vmatprep.subr.bf16.mxu1 %v706_v0  ;;  %v616_v27 = vpack.c.bf16 %v36_v23, %v35_v22  ;;  %v37_v28 = vld [vmem:[%s948_s1 + $0x50] sm:$0xff]  ;;  %v38_v29 = vld [vmem:[%s948_s1 + $0x58] sm:$0xff]  ;;  %v637_v30 = vpack.c.bf16 %v127_v26, %v126_v25  ;;  %v128_v31 = vld [vmem:[%s949_s3 + $0x40] sm:$0xff] }
   0x8   :  { %608 = vmatpush3.bf16.msra.mxu0 %v607_v7  ;;  %v129_v32 = vld [vmem:[%s949_s3 + $0x48] sm:$0xff]  ;;  %v619_v33 = vpack.c.bf16 %v38_v29, %v37_v28  ;;  %v39_v34 = vld [vmem:[%s948_s1 + $0x60] sm:$0xff]  ;;  %v130_v37 = vld [vmem:[%s949_s3 + $0x50] sm:$0xff] }
   0x9   :  { %609 = vmatprep.subr.bf16.mxu0 %v706_v0  ;;  %v40_v35 = vld [vmem:[%s948_s1 + $0x68] sm:$0xff]  ;;  %v640_v36 = vpack.c.bf16 %v129_v32, %v128_v31  ;;  %v131_v38 = vld [vmem:[%s949_s3 + $0x58] sm:$0xff]  ;;  %v41_v40 = vld [vmem:[%s948_s1 + $0x70] sm:$0xff] }
   0xa   :  { %632 = vmatpush3.bf16.msra.mxu1 %v631_v18  ;;  %v622_v39 = vpack.c.bf16 %v40_v35, %v39_v34  ;;  %v42_v41 = vld [vmem:[%s948_s1 + $0x78] sm:$0xff]  ;;  %v643_v42 = vpack.c.bf16 %v131_v38, %v130_v37  ;;  %v132_v43 = vld [vmem:[%s949_s3 + $0x60] sm:$0xff]  ;;  %v133_v44 = vld [vmem:[%s949_s3 + $0x68] sm:$0xff] }
   0xb   :  { %633 = vmatprep.subr.bf16.mxu1 %v706_v0  ;;  %v625_v45 = vpack.c.bf16 %v42_v41, %v41_v40  ;;  %v646_v46 = vpack.c.bf16 %v133_v44, %v132_v43  ;;  %v26_v47 = vld [vmem:[%s950_s0] sm:$0xff]  ;;  %v134_v48 = vld [vmem:[%s949_s3 + $0x70] sm:$0xff]  ;;  %v135_v49 = vld [vmem:[%s949_s3 + $0x78] sm:$0xff] }
   0xc   :  { %611 = vmatpush3.bf16.msra.mxu0 %v610_v14  ;;  %v649_v50 = vpack.c.bf16 %v135_v49, %v134_v48  ;;  %v392_v51 = vld [vmem:[%s951_s2] ss:$0 sm:$0xff]  ;;  %v295_v56 = vld [vmem:[%s952_s5 + $0x8] sm:$0xff]  ;;  %v296_v57 = vld [vmem:[%s952_s5 + $0x10] sm:$0xff] }
   0xd   :  { %612 = vmatprep.subr.bf16.mxu0 %v706_v0  ;;  %v294_v55 = vld [vmem:[%s952_s5] sm:$0xff]  ;;  %v297_v59 = vld [vmem:[%s952_s5 + $0x18] sm:$0xff]  ;;  %v299_v62 = vld [vmem:[%s952_s5 + $0x28] sm:$0xff] }
   0xe   :  { %635 = vmatpush3.bf16.msra.mxu1 %v634_v24  ;;  %v676_v58 = vpack.c.bf16 %v295_v56, %v294_v55  ;;  %v679_v60 = vpack.c.bf16 %v297_v59, %v296_v57  ;;  %v298_v61 = vld [vmem:[%s952_s5 + $0x20] sm:$0xff]  ;;  %v300_v10 = vld [vmem:[%s952_s5 + $0x30] sm:$0xff]  ;;  %v301_v11 = vld [vmem:[%s952_s5 + $0x38] sm:$0xff] }
   0xf   :  { %636 = vmatprep.subr.bf16.mxu1 %v706_v0  ;;  %v682_v63 = vpack.c.bf16 %v299_v62, %v298_v61  ;;  %v393_v1 = vld [vmem:[%s953_s4] ss:$0 sm:$0xff]  ;;  %v685_v12 = vpack.c.bf16 %v301_v11, %v300_v10  ;;  %v303_v14 = vld [vmem:[%s952_s5 + $0x48] sm:$0xff]  ;;  %v304_v16 = vld [vmem:[%s952_s5 + $0x50] sm:$0xff] }
  0x10   :  { %614 = vmatpush3.bf16.msra.mxu0 %v613_v21  ;;  %v302_v13 = vld [vmem:[%s952_s5 + $0x40] sm:$0xff]  ;;  %v305_v17 = vld [vmem:[%s952_s5 + $0x58] sm:$0xff]  ;;  %v307_v20 = vld [vmem:[%s952_s5 + $0x68] sm:$0xff] }
  0x11   :  { %615 = vmatprep.subr.bf16.mxu0 %v706_v0  ;;  %v306_v19 = vld [vmem:[%s952_s5 + $0x60] sm:$0xff]  ;;  %v308_v22 = vld [vmem:[%s952_s5 + $0x70] sm:$0xff]  ;;  %v309_v23 = vld [vmem:[%s952_s5 + $0x78] sm:$0xff] }
  0x12   :  { %638 = vmatpush3.bf16.msra.mxu1 %v637_v30  ;;  %v694_v21 = vpack.c.bf16 %v307_v20, %v306_v19 }
  0x13   :  { %639 = vmatprep.subr.bf16.mxu1 %v706_v0 }
  0x14   :  { %617 = vmatpush3.bf16.msra.mxu0 %v616_v27 }
  0x15   :  { %618 = vmatprep.subr.bf16.mxu0 %v706_v0 }
  0x16   :  { %641 = vmatpush3.bf16.msra.mxu1 %v640_v36 }
  0x17   :  { %642 = vmatprep.subr.bf16.mxu1 %v706_v0 }
  0x18   :  { %620 = vmatpush3.bf16.msra.mxu0 %v619_v33 }
  0x19   :  { %621 = vmatprep.subr.bf16.mxu0 %v706_v0 }
  0x1a   :  { %644 = vmatpush3.bf16.msra.mxu1 %v643_v42 }
  0x1b   :  { %645 = vmatprep.subr.bf16.mxu1 %v706_v0 }
  0x1c   :  { %623 = vmatpush3.bf16.msra.mxu0 %v622_v39 }
  0x1d   :  { %624 = vmatprep.subr.bf16.mxu0 %v706_v0 }
  0x1e   :  { %647 = vmatpush3.bf16.msra.mxu1 %v646_v46 }
  0x1f   :  { %648 = vmatprep.subr.bf16.mxu1 %v706_v0 }
  0x20   :  { %626 = vmatpush3.bf16.msra.mxu0 %v625_v45 }
  0x21   :  { %651 = vmatprep.subr.bf16.mxu0 %v706_v0 }
  0x22   :  { %650 = vmatpush3.bf16.msra.mxu1 %v649_v50 }
  0x23   :  { %496 = vmatmul.mubr.f32.vlgmr.msra.gmra.mrb[0].mxu0 %v26_v47  ;;  %675 = vmatprep.subr.bf16.mxu1 %v706_v0 }
  0x24   :  { %653 = vmatpush3.bf16.msra.mxu0 %v628_v15  ;;  %565 = vmatprep.mubr.msk.f32.mxu0 %vm707_vm0, %v708_v4  ;;  %v688_v15 = vpack.c.bf16 %v303_v14, %v302_v13 }
  0x25   :  { %654 = vmatprep.subr.bf16.mxu0 %v706_v0 }
  0x28   :  { %656 = vmatpush3.bf16.msra.mxu0 %v631_v18  ;;  %v691_v18 = vpack.c.bf16 %v305_v17, %v304_v16 }
  0x29   :  { %657 = vmatprep.subr.bf16.mxu0 %v706_v0 }
  0x2c   :  { %659 = vmatpush3.bf16.msra.mxu0 %v634_v24  ;;  %v697_v24 = vpack.c.bf16 %v309_v23, %v308_v22 }
  0x2d   :  { %660 = vmatprep.subr.bf16.mxu0 %v706_v0 }
  0x30   :  { %662 = vmatpush3.bf16.msra.mxu0 %v637_v30 }
  0x31   :  { %663 = vmatprep.subr.bf16.mxu0 %v706_v0 }
  0x34   :  { %665 = vmatpush3.bf16.msra.mxu0 %v640_v36 }
  0x35   :  { %666 = vmatprep.subr.bf16.mxu0 %v706_v0 }
  0x38   :  { %668 = vmatpush3.bf16.msra.mxu0 %v643_v42 }
  0x39   :  { %669 = vmatprep.subr.bf16.mxu0 %v706_v0 }
  0x3c   :  { %671 = vmatpush3.bf16.msra.mxu0 %v646_v46 }
  0x3d   :  { %672 = vmatprep.subr.bf16.mxu0 %v706_v0 }
  0x40   :  { %674 = vmatpush3.bf16.msra.mxu0 %v649_v50 }
  0xf6   :  { %v116_v52 = vpop.f32.mrb[0].mxu0 }
  0xf7   :  { %v117_v53 = vadd.f32 %v392_v51, %v116_v52  ;;  %v497_v54 = vpop.f32.mrb[1].mxu0 }
  0xf9   :  { %531 = vmatmul.mubr.f32.vlgmr.msra.gmra.mrb[0].mxu1 %v117_v53 }
  0xfa   :  { %600 = vmatprep.mubr.msk.f32.mxu1 %vm707_vm0, %v708_v4  ;;  %677 = vmatpush3.bf16.msra.mxu1 %v676_v58 }
  0xfb   :  { %678 = vmatprep.subr.bf16.mxu1 %v706_v0 }
  0xfe   :  { %680 = vmatpush3.bf16.msra.mxu1 %v679_v60 }
  0xff   :  { %681 = vmatprep.subr.bf16.mxu1 %v706_v0 }
 0x102   :  { %683 = vmatpush3.bf16.msra.mxu1 %v682_v63 }
 0x103   :  { %684 = vmatprep.subr.bf16.mxu1 %v706_v0 }
 0x106   :  { %686 = vmatpush3.bf16.msra.mxu1 %v685_v12 }
 0x107   :  { %687 = vmatprep.subr.bf16.mxu1 %v706_v0 }
 0x10a   :  { %689 = vmatpush3.bf16.msra.mxu1 %v688_v15 }
 0x10b   :  { %690 = vmatprep.subr.bf16.mxu1 %v706_v0 }
 0x10e   :  { %692 = vmatpush3.bf16.msra.mxu1 %v691_v18 }
 0x10f   :  { %693 = vmatprep.subr.bf16.mxu1 %v706_v0 }
 0x112   :  { %695 = vmatpush3.bf16.msra.mxu1 %v694_v21 }
 0x113   :  { %696 = vmatprep.subr.bf16.mxu1 %v706_v0  ;;  %v394_v0 = vld [vmem:[%s954_s6] ss:$0 sm:$0xff] }
 0x116   :  { %698 = vmatpush3.bf16.msra.mxu1 %v697_v24 }
 0x1cc   :  { %v209_v2 = vpop.f32.mrb[0].mxu1 }
 0x1cd   :  { %v210_v3 = vadd.f32 %v393_v1, %v209_v2  ;;  %v532_v4 = vpop.f32.mrb[1].mxu1 }
 0x1cf   :  { %v215_v5 = vmul.f32 0.70710677, %v210_v3  ;;  %v213_v7 = vmul.f32 0.5, %v210_v3 }
 0x1d1   :  { %702 = verf.f32 %v215_v5 }
 0x1db   :  { %v703_v6 = vpop.eup %702 }
 0x1dc   :  { %v217_v8 = vadd.f32 1.0, %v703_v6 }
 0x1de   :  { %v218_v9 = vmul.f32 %v217_v8, %v213_v7 }
 0x1e0   :  { %566 = vmatmul.mubr.f32.vlgmr.msra.gmra.mrb[2].mxu0 %v218_v9 }
 0x2b3   :  { %v285_v25 = vpop.f32.mrb[2].mxu0 }
 0x2b4   :  { %v286_v26 = vadd.f32 %v393_v1, %v285_v25  ;;  %v567_v27 = vpop.f32.mrb[3].mxu0 }
 0x2b6   :  { %v290_v28 = vmul.f32 0.70710677, %v286_v26  ;;  %v289_v30 = vmul.f32 0.5, %v286_v26 }
 0x2b8   :  { %704 = verf.f32 %v290_v28 }
 0x2c2   :  { %v705_v29 = vpop.eup %704 }
 0x2c3   :  { %v292_v31 = vadd.f32 1.0, %v705_v29 }
 0x2c5   :  { %v293_v32 = vmul.f32 %v292_v31, %v289_v30 }
 0x2c7   :  { %601 = vmatmul.mubr.f32.vlgmr.msra.gmra.mrb[2].mxu1 %v293_v32 }
 0x39a   :  { %v383_v33 = vpop.f32.mrb[2].mxu1 }
 0x39b   :  { %v384_v34 = vadd.f32 %v394_v0, %v383_v33  ;;  %v602_v35 = vpop.f32.mrb[3].mxu1 }
 0x39d   :  { %387 = vst [vmem:[%s955_s7] sm:$0xff] %v384_v34 }

</bundles_post_ra>
